<compile_context>
chip_gen: v7x
topology: tpu7x:2x2x1
jax: 0.10.0
libtpu: 0.0.40
codegen_flags: <defaults>
</compile_context>

<pallas_src>
import jax
import jax.numpy as jnp
from jax.experimental import pallas as pl
from jax.experimental.pallas import tpu as pltpu

VOCAB_SIZE = 16
EMBED_DIM = 32     # must equal ENCODE_DIM (the PyTorch code index_copies
ENCODE_DIM = 32    # embedding_dim vectors into an encode_dim buffer)
BATCH_SIZE = 2

LANE = 128         # TPU lane width: feature axis padded to this
SUBLANE = 8        # sublane tile: per-level row counts padded to a multiple


def _round_up(x, m):
    return ((x + m - 1) // m) * m


def _sigmoid(x):
    # Exact identity sigmoid(x) = 0.5*(tanh(x/2)+1): numerically stable for
    # large |x| and tanh runs on the EUP slot (free next to the VALU work).
    return 0.5 * (jnp.tanh(0.5 * x) + 1.0)


def _gru_body(x, h, w_ih, w_hh, b_i, b_h, dp):
    """Packed-gate GRU cell.

    w_ih: [Dp, 3*Dp] bf16, w_hh: [Dp, 3*Dp] bf16 with gate blocks [r|z|n]
    along the lane axis; b_i/b_h: [1, 3*Dp] f32.  Two matmuls instead of six.
    """
    gi = jnp.dot(x.astype(jnp.bfloat16), w_ih,
                 preferred_element_type=jnp.float32) + b_i
    gh = jnp.dot(h.astype(jnp.bfloat16), w_hh,
                 preferred_element_type=jnp.float32) + b_h
    r = _sigmoid(gi[:, 0:dp] + gh[:, 0:dp])
    z = _sigmoid(gi[:, dp:2 * dp] + gh[:, dp:2 * dp])
    n = jnp.tanh(gi[:, 2 * dp:3 * dp] + r * gh[:, 2 * dp:3 * dp])
    return (1.0 - z) * n + z * h


# ---------------------------------------------------------------------------
# Kernel 1: fused child-attention pooling + GRU cell (one call per tree level
# that has children).
#   u_c = tanh(H_c @ sent_w + sent_b); s_c = tanh(sum_d u_c * ctx_w)
#   w   = softmax_c(s_c) per node;     h   = sum_c w_c * H_c
#   hn  = GRUCell(x, h)
# ---------------------------------------------------------------------------
def att_gru_kernel(ch_ref, x_ref, w_ih_ref, w_hh_ref, b_i_ref, b_h_ref,
                   sw_ref, sb_ref, cw_ref, o_ref):
    C, N, Dp = ch_ref.shape
    ch = ch_ref[...]                                          # [C, N, Dp] f32

    # Batched u-projection: single [C*N, Dp] x [Dp, Dp] matmul (one MXU
    # weight push) instead of C tiny matmuls.  N is a multiple of 8 so the
    # merge/split reshapes are sublane-tile aligned (layout no-ops).
    flat = ch.reshape(C * N, Dp)
    u = jnp.tanh(jnp.dot(flat.astype(jnp.bfloat16), sw_ref[...],
                         preferred_element_type=jnp.float32) + sb_ref[...])
    u = u.reshape(C, N, Dp)
    s = jnp.tanh(jnp.sum(u * cw_ref[...], axis=-1, keepdims=True))   # [C, N, 1]

    # Softmax over the children axis per node (== F.softmax over dim=1 of [N, C]).
    m = jnp.max(s, axis=0, keepdims=True)
    e = jnp.exp(s - m)
    w = e / jnp.sum(e, axis=0, keepdims=True)
    h = jnp.sum(w * ch, axis=0)                                       # [N, Dp]

    o_ref[...] = _gru_body(x_ref[...], h, w_ih_ref[...], w_hh_ref[...],
                           b_i_ref[...], b_h_ref[...], Dp)


def fused_att_gru(child_hiddens, batch_current, p):
    _, n, dp = child_hiddens.shape
    return pl.pallas_call(
        att_gru_kernel,
        out_shape=jax.ShapeDtypeStruct((n, dp), jnp.float32),
    )(child_hiddens, batch_current,
      p["w_ih"], p["w_hh"], p["b_i"], p["b_h"],
      p["sent_w"], p["sent_b"], p["ctx_w"])


# ---------------------------------------------------------------------------
# Kernel 2: GRU-only level (leaves / no-attention path).
# ---------------------------------------------------------------------------
def gru_kernel(x_ref, h_ref, w_ih_ref, w_hh_ref, b_i_ref, b_h_ref, o_ref):
    dp = x_ref.shape[-1]
    o_ref[...] = _gru_body(x_ref[...], h_ref[...], w_ih_ref[...], w_hh_ref[...],
                           b_i_ref[...], b_h_ref[...], dp)


def gru_level(batch_current, h, p):
    n, dp = batch_current.shape
    return pl.pallas_call(
        gru_kernel,
        out_shape=jax.ShapeDtypeStruct((n, dp), jnp.float32),
    )(batch_current, h, p["w_ih"], p["w_hh"], p["b_i"], p["b_h"])


# ---------------------------------------------------------------------------
# Kernel 3: torch.max(node_list, 0)[0] — streaming elementwise max over the
# L axis with the output block resident across the ("arbitrary") grid axis.
# ---------------------------------------------------------------------------
def max_reduce_kernel(nl_ref, o_ref):
    l = pl.program_id(0)

    @pl.when(l == 0)
    def _():
        o_ref[...] = nl_ref[0]

    @pl.when(l > 0)
    def _():
        o_ref[...] = jnp.maximum(o_ref[...], nl_ref[0])


def max_over_nodes(node_stack):
    L, b, dp = node_stack.shape
    return pl.pallas_call(
        max_reduce_kernel,
        out_shape=jax.ShapeDtypeStruct((b, dp), jnp.float32),
        grid_spec=pltpu.PrefetchScalarGridSpec(
            num_scalar_prefetch=0,
            grid=(L,),
            in_specs=[pl.BlockSpec((1, b, dp), lambda l: (l, 0, 0))],
            out_specs=pl.BlockSpec((b, dp), lambda l: (0, 0)),
        ),
        compiler_params=pltpu.CompilerParams(
            dimension_semantics=("arbitrary",)),
    )(node_stack)


# ---------------------------------------------------------------------------
# Host-side module mirroring the PyTorch BatchTreeEncoder forward semantics.
# All device buffers keep the feature axis padded to Dp=128; padded lanes stay
# exactly zero through attention and GRU, so results in lanes [0, D) match the
# unpadded math; the final output is sliced back to D.
# ---------------------------------------------------------------------------
class BatchTreeEncoderJAX:
    def __init__(self, vocab_size, embedding_dim, encode_dim, batch_size, key):
        assert embedding_dim == encode_dim, \
            "PyTorch code scatters embeddings into an encode_dim buffer"
        self.encode_dim = encode_dim
        self.dp = _round_up(encode_dim, LANE)          # 32 -> 128
        self.batch_size = batch_size
        self.use_att = True
        D, E, Dp = encode_dim, embedding_dim, self.dp

        (k_emb, k_wih, k_whh, k_bih, k_bhh,
         k_sw, k_sb, k_cw) = jax.random.split(key, 8)

        emb = jax.random.normal(k_emb, (vocab_size, E), jnp.float32)
        self.embedding_p = jnp.zeros((vocab_size, Dp), jnp.float32).at[:, :E].set(emb)

        # nn.GRU(E, D, 1) parameters, PyTorch gate order [r; z; n], packed into
        # [Dp, 3*Dp] input/hidden matrices (one matmul each) + [1, 3*Dp] biases.
        std = 1.0 / (D ** 0.5)
        w_ih = jax.random.uniform(k_wih, (3 * D, E), jnp.float32, -std, std)
        w_hh = jax.random.uniform(k_whh, (3 * D, D), jnp.float32, -std, std)
        b_ih = jax.random.uniform(k_bih, (3 * D,), jnp.float32, -std, std)
        b_hh = jax.random.uniform(k_bhh, (3 * D,), jnp.float32, -std, std)

        w_ih_p = jnp.zeros((Dp, 3 * Dp), jnp.float32)
        w_hh_p = jnp.zeros((Dp, 3 * Dp), jnp.float32)
        b_i_p = jnp.zeros((1, 3 * Dp), jnp.float32)
        b_h_p = jnp.zeros((1, 3 * Dp), jnp.float32)
        for g in range(3):
            w_ih_p = w_ih_p.at[:E, g * Dp:g * Dp + D].set(w_ih[g * D:(g + 1) * D, :].T)
            w_hh_p = w_hh_p.at[:D, g * Dp:g * Dp + D].set(w_hh[g * D:(g + 1) * D, :].T)
            b_i_p = b_i_p.at[0, g * Dp:g * Dp + D].set(b_ih[g * D:(g + 1) * D])
            b_h_p = b_h_p.at[0, g * Dp:g * Dp + D].set(b_hh[g * D:(g + 1) * D])

        # attention parameters (init_weights: normal(0, 0.05)); context_weight
        # has torch shape (D, 1) and is stored here as a lane-padded row.
        sent_w = 0.05 * jax.random.normal(k_sw, (D, D), jnp.float32)
        sent_b = 0.05 * jax.random.normal(k_sb, (1, D), jnp.float32)
        ctx_w = 0.05 * jax.random.normal(k_cw, (D, 1), jnp.float32)

        self.params = {
            # bf16 matmul weights (native MXU path on all generations),
            # f32 accumulation via preferred_element_type inside the kernels.
            "w_ih": w_ih_p.astype(jnp.bfloat16),
            "w_hh": w_hh_p.astype(jnp.bfloat16),
            "b_i": b_i_p,
            "b_h": b_h_p,
            "sent_w": jnp.zeros((Dp, Dp), jnp.float32)
                         .at[:D, :D].set(sent_w).astype(jnp.bfloat16),
            "sent_b": jnp.zeros((1, Dp), jnp.float32).at[0, :D].set(sent_b[0]),
            "ctx_w": jnp.zeros((1, Dp), jnp.float32).at[0, :D].set(ctx_w[:, 0]),
        }

        # TODO(synk): W_c / W_l / W_r linears (+ F.relu) are defined in the
        # PyTorch __init__ but never used in forward(); intentionally omitted.
        # TODO(synk): embedding gather / per-level index_copy scatter could be
        # pulled into the fused kernel via PrefetchScalarGridSpec index arrays;
        # kept host-side here to mirror the PyTorch control flow exactly.

        self.node_list = []
        self.batch_node = None

    def traverse_mul(self, node, batch_index):
        size = len(node)
        if not size:
            return None
        Dp = self.dp
        size_p = _round_up(size, SUBLANE)
        batch_current = jnp.zeros((size_p, Dp), jnp.float32)

        index, children_index = [], []
        current_node, children = [], []
        for i in range(size):
            if node[i][0] != -1:
                index.append(i)
                current_node.append(node[i][0])
                temp = node[i][1:]
                for j in range(len(temp)):
                    if temp[j][0] != -1:
                        if len(children_index) <= j:
                            children_index.append([i])
                            children.append([temp[j]])
                        else:
                            children_index[j].append(i)
                            children[j].append(temp[j])
            else:
                batch_index[i] = -1

        if index:
            emb = self.embedding_p[jnp.asarray(current_node, jnp.int32)]
            batch_current = batch_current.at[jnp.asarray(index, jnp.int32)].set(emb)

        hidden_per_child = []
        for c in range(len(children)):
            batch_children_index = [batch_index[i] for i in children_index[c]]
            tree = self.traverse_mul(children[c], batch_children_index)
            if tree is not None:
                cur = jnp.zeros((size_p, Dp), jnp.float32)
                cur = cur.at[jnp.asarray(children_index[c], jnp.int32)].set(tree)
                hidden_per_child.append(cur)

        if self.use_att and len(hidden_per_child) != 0:
            child_hiddens = jnp.stack(hidden_per_child)        # [C, size_p, Dp]
            # fused: attention pooling + GRU in one pallas_call
            hn = fused_att_gru(child_hiddens, batch_current, self.params)
        else:
            if hidden_per_child:                               # use_att == False path
                h = hidden_per_child[0]
                for c in range(1, len(hidden_per_child)):
                    h = h + hidden_per_child[c]
            else:
                h = jnp.zeros((size_p, Dp), jnp.float32)
            hn = gru_level(batch_current, h, self.params)      # [size_p, Dp]

        # index_copy of hn into a fresh (zero) batch_node snapshot (out-of-place,
        # as in PyTorch).  Select hn rows at positions where batch_index != -1
        # (fixes the previous hn[:len(kept)] bug when -1 entries precede valid ones).
        valid_rows = [i for i, b in enumerate(batch_index) if b != -1]
        kept = [batch_index[i] for i in valid_rows]
        if kept:
            nd_tmp = self.batch_node.at[jnp.asarray(kept, jnp.int32)].set(
                hn[jnp.asarray(valid_rows, jnp.int32)])
        else:
            nd_tmp = self.batch_node
        self.node_list.append(nd_tmp)
        return hn[:size]

    def forward(self, x, bs):
        self.batch_size = bs
        self.batch_node = jnp.zeros((bs, self.dp), jnp.float32)
        self.node_list = []
        self.traverse_mul(x, list(range(bs)))
        node_stack = jnp.stack(self.node_list)                 # [L, bs, Dp]
        pooled = max_over_nodes(node_stack)                    # [bs, Dp]
        return pooled[:, :self.encode_dim]                     # strip lane padding


if __name__ == "__main__":
    key = jax.random.PRNGKey(0)
    enc = BatchTreeEncoderJAX(VOCAB_SIZE, EMBED_DIM, ENCODE_DIM, BATCH_SIZE, key)

    # batch of 2 small trees: node = [token, child_node, child_node, ...]
    x = [
        [3, [5, [7], [2]], [1]],
        [4, [6], [8, [9]]],
    ]

    out = enc.forward(x, bs=BATCH_SIZE)
    out = jax.block_until_ready(out)
    assert out.shape == (BATCH_SIZE, ENCODE_DIM)
    assert bool(jnp.all(jnp.isfinite(out)))
    print("KERNEL_OK")
</pallas_src>

<mosaic_0001>
module attributes {stable_mosaic.version = 11 : i64} {
  func.func @gru_kernel(%arg0: memref<8x128xf32, #tpu.memory_space<vmem>>, %arg1: memref<8x128xf32, #tpu.memory_space<vmem>>, %arg2: memref<128x384xbf16, #tpu.memory_space<vmem>>, %arg3: memref<128x384xbf16, #tpu.memory_space<vmem>>, %arg4: memref<1x384xf32, #tpu.memory_space<vmem>>, %arg5: memref<1x384xf32, #tpu.memory_space<vmem>>, %arg6: memref<8x128xf32, #tpu.memory_space<vmem>>) attributes {dimension_semantics = [], scalar_prefetch = 0 : i64, scratch_operands = 0 : i64, tpu.core_type = #tpu.core_type<tc>} {
    %c0 = arith.constant 0 : index
    %c0_0 = arith.constant 0 : index
    %0 = vector.load %arg0[%c0, %c0_0] : memref<8x128xf32, #tpu.memory_space<vmem>>, vector<8x128xf32>
    %c0_1 = arith.constant 0 : index
    %c0_2 = arith.constant 0 : index
    %1 = vector.load %arg1[%c0_1, %c0_2] : memref<8x128xf32, #tpu.memory_space<vmem>>, vector<8x128xf32>
    %c0_3 = arith.constant 0 : index
    %c0_4 = arith.constant 0 : index
    %2 = vector.load %arg2[%c0_3, %c0_4] : memref<128x384xbf16, #tpu.memory_space<vmem>>, vector<128x384xbf16>
    %c0_5 = arith.constant 0 : index
    %c0_6 = arith.constant 0 : index
    %3 = vector.load %arg3[%c0_5, %c0_6] : memref<128x384xbf16, #tpu.memory_space<vmem>>, vector<128x384xbf16>
    %c0_7 = arith.constant 0 : index
    %c0_8 = arith.constant 0 : index
    %4 = vector.load %arg4[%c0_7, %c0_8] : memref<1x384xf32, #tpu.memory_space<vmem>>, vector<1x384xf32>
    %c0_9 = arith.constant 0 : index
    %c0_10 = arith.constant 0 : index
    %5 = vector.load %arg5[%c0_9, %c0_10] : memref<1x384xf32, #tpu.memory_space<vmem>>, vector<1x384xf32>
    %6 = arith.truncf %0 : vector<8x128xf32> to vector<8x128xbf16>
    %cst = arith.constant dense<0.000000e+00> : vector<8x384xf32>
    %7 = tpu.matmul %6, %2, %cst {dimension_numbers = #tpu.dot_dimension_numbers<[1], [0], [0], [1], [0, 0, 1, 1], [], []>} : vector<8x128xbf16>, vector<128x384xbf16>, vector<8x384xf32> -> vector<8x384xf32>
    %8 = vector.broadcast %4 : vector<1x384xf32> to vector<8x384xf32>
    %9 = arith.addf %7, %8 : vector<8x384xf32>
    %10 = arith.truncf %1 : vector<8x128xf32> to vector<8x128xbf16>
    %cst_11 = arith.constant dense<0.000000e+00> : vector<8x384xf32>
    %11 = tpu.matmul %10, %3, %cst_11 {dimension_numbers = #tpu.dot_dimension_numbers<[1], [0], [0], [1], [0, 0, 1, 1], [], []>} : vector<8x128xbf16>, vector<128x384xbf16>, vector<8x384xf32> -> vector<8x384xf32>
    %12 = vector.broadcast %5 : vector<1x384xf32> to vector<8x384xf32>
    %13 = arith.addf %11, %12 : vector<8x384xf32>
    %14 = vector.extract_strided_slice %9 {offsets = [0, 0], sizes = [8, 128], strides = [1, 1]} : vector<8x384xf32> to vector<8x128xf32>
    %15 = vector.extract_strided_slice %13 {offsets = [0, 0], sizes = [8, 128], strides = [1, 1]} : vector<8x384xf32> to vector<8x128xf32>
    %16 = arith.addf %14, %15 : vector<8x128xf32>
    %cst_12 = arith.constant 5.000000e-01 : f32
    %17 = vector.broadcast %cst_12 : f32 to vector<8x128xf32>
    %18 = arith.mulf %17, %16 : vector<8x128xf32>
    %19 = math.tanh %18 : vector<8x128xf32>
    %cst_13 = arith.constant 1.000000e+00 : f32
    %20 = vector.broadcast %cst_13 : f32 to vector<8x128xf32>
    %21 = arith.addf %19, %20 : vector<8x128xf32>
    %cst_14 = arith.constant 5.000000e-01 : f32
    %22 = vector.broadcast %cst_14 : f32 to vector<8x128xf32>
    %23 = arith.mulf %22, %21 : vector<8x128xf32>
    %24 = vector.extract_strided_slice %9 {offsets = [0, 128], sizes = [8, 128], strides = [1, 1]} : vector<8x384xf32> to vector<8x128xf32>
    %25 = vector.extract_strided_slice %13 {offsets = [0, 128], sizes = [8, 128], strides = [1, 1]} : vector<8x384xf32> to vector<8x128xf32>
    %26 = arith.addf %24, %25 : vector<8x128xf32>
    %cst_15 = arith.constant 5.000000e-01 : f32
    %27 = vector.broadcast %cst_15 : f32 to vector<8x128xf32>
    %28 = arith.mulf %27, %26 : vector<8x128xf32>
    %29 = math.tanh %28 : vector<8x128xf32>
    %cst_16 = arith.constant 1.000000e+00 : f32
    %30 = vector.broadcast %cst_16 : f32 to vector<8x128xf32>
    %31 = arith.addf %29, %30 : vector<8x128xf32>
    %cst_17 = arith.constant 5.000000e-01 : f32
    %32 = vector.broadcast %cst_17 : f32 to vector<8x128xf32>
    %33 = arith.mulf %32, %31 : vector<8x128xf32>
    %34 = vector.extract_strided_slice %9 {offsets = [0, 256], sizes = [8, 128], strides = [1, 1]} : vector<8x384xf32> to vector<8x128xf32>
    %35 = vector.extract_strided_slice %13 {offsets = [0, 256], sizes = [8, 128], strides = [1, 1]} : vector<8x384xf32> to vector<8x128xf32>
    %36 = arith.mulf %23, %35 : vector<8x128xf32>
    %37 = arith.addf %34, %36 : vector<8x128xf32>
    %38 = math.tanh %37 : vector<8x128xf32>
    %cst_18 = arith.constant 1.000000e+00 : f32
    %39 = vector.broadcast %cst_18 : f32 to vector<8x128xf32>
    %40 = arith.subf %39, %33 : vector<8x128xf32>
    %41 = arith.mulf %40, %38 : vector<8x128xf32>
    %42 = arith.mulf %33, %1 : vector<8x128xf32>
    %43 = arith.addf %41, %42 : vector<8x128xf32>
    %c0_19 = arith.constant 0 : index
    %c0_20 = arith.constant 0 : index
    %44 = vector.load %arg6[%c0_19, %c0_20] : memref<8x128xf32, #tpu.memory_space<vmem>>, vector<8x128xf32>
    tpu.vector_store %arg6[%c0_19, %c0_20], %43 {strides = array<i32>} : memref<8x128xf32, #tpu.memory_space<vmem>>, vector<8x128xf32>,
    return
  }
}

</mosaic_0001>

<bundles_post_ra>
// kernel: tpu_custom_call.1
= control target key start
LH: loop header
LB: loop body
LE: loop exit
PB: predicated region body
PF: predicated region fallthrough
CT: control target
= control target key end

     0   :  { %11 = vsyncpa [#allocation3], 0  ;;  %s1076_s0 = inlined_call_operand.hbm [shape: f32[8,128], index: 0, kind: input, shape index: {}]   ;;  %s1077_s1 = inlined_call_operand.hbm [shape: f32[8,128], index: 1, kind: input, shape index: {}]   ;;  %s1078_s2 = inlined_call_operand.hbm [shape: bf16[128,384], index: 2, kind: input, shape index: {}]   ;;  %s1079_s3 = inlined_call_operand.hbm [shape: bf16[128,384], index: 3, kind: input, shape index: {}]   ;;  %s1080_s4 = inlined_call_operand.vmem [shape: f32[1,384], index: 4, kind: input, shape index: {}]   ;;  %s1081_s5 = inlined_call_operand.vmem [shape: f32[1,384], index: 5, kind: input, shape index: {}]   ;;  %s1082_s6 = inlined_call_operand.hbm [shape: f32[8,128], index: 6, kind: output, shape index: {}]  }
   0x1   :  { %12 = vsyncpa [#allocation6], 0 }
   0x2   :  { %13 = vsyncpa [#allocation9], 0 }
   0x3   :  { %14 = vsyncpa [#allocation4], 0  ;;  %s943_s21 = smov [#allocation5]   ;;  %s944_s23 = smov [#allocation2]  }
   0x4   :  { %s31_s22 = sshll.u32 %s943_s21, 4  ;;  %s21_s24 = sshll.u32 %s944_s23, 4  ;;  %s32_s22 = int_to_ptr.vmem [resolvable:$true] %s31_s22  ;;  %s22_s24 = int_to_ptr.vmem [resolvable:$true] %s21_s24 }
   0x5   :  { %s825_s27 = scalar_lea.hbm %s1077_s1, 128 }
   0x6   :  { %p826_p0 = scmp.ne.s32.totalorder %s1077_s1, %s825_s27  ;;  %p829_p1 = scmp.lt.u32.totalorder %s825_s27, %s1077_s1 }
   0x8   :  { %p831_p2 = pnand %p829_p1, %p826_p0 }
   0xa   :  { %834 = shalt.err (!%p831_p2)
}
   0xb   :  { %s835_s8 = scalar_lea.vmem %s32_s22, 128  ;;  %p840_p4 = scmp.lt.s32.totalorder %s32_s22, %s32_s22 }
   0xc   :  { %p836_p3 = scmp.ne.s32.totalorder %s32_s22, %s835_s8  ;;  %p841_p5 = scmp.lt.s32.totalorder %s835_s8, %s835_s8 }
   0xe   :  { %p842_p6 = por %p841_p5, %p840_p4 }
  0x10   :  { %p843_p7 = pnand %p842_p6, %p836_p3 }
  0x12   :  { %846 = shalt.err (!%p843_p7)
}
  0x13   :  { %34 = dma.hbm_to_vmem [thread:$0]  %s1077_s1, 128, %s32_s22, [#allocation6]  }
  0x14   :  { %s847_s13 = scalar_lea.hbm %s1076_s0, 128 }
  0x15   :  { %p848_p8 = scmp.ne.s32.totalorder %s1076_s0, %s847_s13  ;;  %p851_p9 = scmp.lt.u32.totalorder %s847_s13, %s1076_s0 }
  0x17   :  { %p853_p10 = pnand %p851_p9, %p848_p8 }
  0x19   :  { %856 = shalt.err (!%p853_p10)
}
  0x1a   :  { %s857_s18 = scalar_lea.vmem %s22_s24, 128  ;;  %p862_p12 = scmp.lt.s32.totalorder %s22_s24, %s22_s24 }
  0x1b   :  { %p858_p11 = scmp.ne.s32.totalorder %s22_s24, %s857_s18  ;;  %p863_p13 = scmp.lt.s32.totalorder %s857_s18, %s857_s18 }
  0x1d   :  { %p864_p0 = por %p863_p13, %p862_p12 }
  0x1f   :  { %p865_p1 = pnand %p864_p0, %p858_p11 }
  0x21   :  { %868 = shalt.err (!%p865_p1)
}
  0x22   :  { %24 = dma.hbm_to_vmem [thread:$0]  %s1076_s0, 128, %s22_s24, [#allocation3]  }
  0x23   :  { %s945_s20 = smov [#allocation7]   ;;  %s869_s25 = scalar_lea.hbm %s1078_s2, 3072 }
  0x24   :  { %s40_s21 = sshll.u32 %s945_s20, 4  ;;  %p870_p2 = scmp.ne.s32.totalorder %s1078_s2, %s869_s25  ;;  %s41_s21 = int_to_ptr.vmem [resolvable:$true] %s40_s21 }
  0x25   :  { %p873_p3 = scmp.lt.u32.totalorder %s869_s25, %s1078_s2 }
  0x27   :  { %p875_p4 = pnand %p873_p3, %p870_p2 }
  0x29   :  { %878 = shalt.err (!%p875_p4)
}
  0x2a   :  { %s879_s30 = scalar_lea.vmem %s41_s21, 3072  ;;  %p884_p6 = scmp.lt.s32.totalorder %s41_s21, %s41_s21 }
  0x2b   :  { %p880_p5 = scmp.ne.s32.totalorder %s41_s21, %s879_s30  ;;  %p885_p7 = scmp.lt.s32.totalorder %s879_s30, %s879_s30 }
  0x2d   :  { %p886_p8 = por %p885_p7, %p884_p6 }
  0x2f   :  { %p887_p9 = pnand %p886_p8, %p880_p5 }
  0x31   :  { %890 = shalt.err (!%p887_p9)
}
  0x32   :  { %s946_s0 = smov 192   ;;  %s947_s24 = smov 12  }
  0x33   :  { %46 = dma.hbm_to_vmem [thread:$0]  %s1078_s2, 3072, %s41_s21, [#allocation6], %s946_s0, %s946_s0, %s947_s24  }
  0x34   :  { %s948_s9 = smov [#allocation8]   ;;  %s891_s13 = scalar_lea.hbm %s1079_s3, 3072 }
  0x35   :  { %s52_s10 = sshll.u32 %s948_s9, 4  ;;  %p892_p10 = scmp.ne.s32.totalorder %s1079_s3, %s891_s13  ;;  %s53_s10 = int_to_ptr.vmem [resolvable:$true] %s52_s10 }
  0x36   :  { %p895_p11 = scmp.lt.u32.totalorder %s891_s13, %s1079_s3 }
  0x38   :  { %p897_p12 = pnand %p895_p11, %p892_p10 }
  0x3a   :  { %900 = shalt.err (!%p897_p12)
}
  0x3b   :  { %s901_s18 = scalar_lea.vmem %s53_s10, 3072  ;;  %p906_p0 = scmp.lt.s32.totalorder %s53_s10, %s53_s10 }
  0x3c   :  { %p902_p13 = scmp.ne.s32.totalorder %s53_s10, %s901_s18  ;;  %p907_p1 = scmp.lt.s32.totalorder %s901_s18, %s901_s18 }
  0x3e   :  { %p908_p2 = por %p907_p1, %p906_p0 }
  0x40   :  { %p909_p3 = pnand %p908_p2, %p902_p13 }
  0x42   :  { %912 = shalt.err (!%p909_p3)
}
  0x43   :  { %58 = dma.hbm_to_vmem [thread:$0]  %s1079_s3, 3072, %s53_s10, [#allocation9], %s946_s0, %s946_s0, %s947_s24  }
  0x44   :  { %935 = dma.done.wait [#allocation3], 128  }
  0x45   :  { %936 = vsyncadd [#allocation3], 4294967168 }
  0x46   :  { %937 = dma.done.wait [#allocation6], 3200  }
  0x47   :  { %938 = vsyncadd [#allocation6], 4294964096 }
  0x48   :  { %939 = dma.done.wait [#allocation9], 3072  }
  0x49   :  { %940 = vsyncadd [#allocation9], 4294964224  ;;  %v949_v0 = vmov 0.0   ;;  %v950_v1 = vmov 0   ;;  %vm951_vm0 = vmmov 0   ;;  %v76_v24 = vld [vmem:[#allocation2] sm:$0xff]  ;;  %v146_v58 = vlaneseq }
  0x4a   :  { %697 = vmatprep.subr.bf16.mxu1 %v949_v0  ;;  %321 = vmatprep.mubr.bf16.mxu0 %v950_v1  ;;  %v755_v2 = vld [vmem:[#allocation7 + $0x4] ss:$12 sps:$4 sm:$0xff]   ;;  %v757_v3 = vld [vmem:[#allocation7] ss:$12 sps:$4 sm:$0xff]   ;;  %v758_v4 = vld [vmem:[#allocation7 + $0x1c] ss:$12 sps:$4 sm:$0xff]   ;;  %v144_v28 = vpack.c.bf16 %v76_v24, %v76_v24 }
  0x4b   :  { %713 = vmatprep.mubr.msk.bf16.mxu1 %vm951_vm0, %v949_v0  ;;  %289 = vmatprep.subr.bf16.mxu0 %v755_v2  ;;  %v760_v5 = vld [vmem:[#allocation7 + $0x18] ss:$12 sps:$4 sm:$0xff]   ;;  %v761_v6 = vld [vmem:[#allocation7 + $0x34] ss:$12 sps:$4 sm:$0xff]   ;;  %v763_v8 = vld [vmem:[#allocation7 + $0x30] ss:$12 sps:$4 sm:$0xff]  }
  0x4c   :  { %290 = vmatpush1.bf16.msra.mxu0 %v757_v3  ;;  %v767_v7 = vld [vmem:[#allocation7 + $0x8] ss:$12 sps:$4 sm:$0xff]   ;;  %v764_v9 = vld [vmem:[#allocation7 + $0x4c] ss:$12 sps:$4 sm:$0xff]   ;;  %v768_v12 = vld [vmem:[#allocation7 + $0x64] ss:$12 sps:$4 sm:$0xff]  }
  0x4d   :  { %291 = vmatprep.subr.bf16.mxu0 %v758_v4  ;;  %698 = vmatpush3.bf16.msra.mxu1 %v767_v7  ;;  %v771_v10 = vld [vmem:[#allocation7 + $0x20] ss:$12 sps:$4 sm:$0xff]   ;;  %v766_v11 = vld [vmem:[#allocation7 + $0x48] ss:$12 sps:$4 sm:$0xff]   ;;  %v775_v13 = vld [vmem:[#allocation7 + $0x38] ss:$12 sps:$4 sm:$0xff]  }
  0x4e   :  { %699 = vmatprep.subr.bf16.mxu1 %v949_v0  ;;  %v770_v14 = vld [vmem:[#allocation7 + $0x60] ss:$12 sps:$4 sm:$0xff]   ;;  %v772_v15 = vld [vmem:[#allocation7 + $0x7c] ss:$12 sps:$4 sm:$0xff]   ;;  %v774_v17 = vld [vmem:[#allocation7 + $0x78] ss:$12 sps:$4 sm:$0xff]  }
  0x4f   :  { %v779_v16 = vld [vmem:[#allocation7 + $0x50] ss:$12 sps:$4 sm:$0xff]   ;;  %v776_v18 = vld [vmem:[#allocation7 + $0x94] ss:$12 sps:$4 sm:$0xff]   ;;  %v780_v21 = vld [vmem:[#allocation7 + $0xac] ss:$12 sps:$4 sm:$0xff]  }
  0x50   :  { %292 = vmatpush1.bf16.msra.mxu0 %v760_v5  ;;  %v783_v19 = vld [vmem:[#allocation7 + $0x68] ss:$12 sps:$4 sm:$0xff]   ;;  %v778_v20 = vld [vmem:[#allocation7 + $0x90] ss:$12 sps:$4 sm:$0xff]   ;;  %v787_v22 = vld [vmem:[#allocation7 + $0x80] ss:$12 sps:$4 sm:$0xff]  }
  0x51   :  { %293 = vmatprep.subr.bf16.mxu0 %v761_v6  ;;  %700 = vmatpush3.bf16.msra.mxu1 %v771_v10  ;;  %v782_v23 = vld [vmem:[#allocation7 + $0xa8] ss:$12 sps:$4 sm:$0xff]   ;;  %v786_v25 = vld [vmem:[#allocation8 + $0x4] ss:$12 sps:$4 sm:$0xff]   ;;  %v784_v27 = vld [vmem:[#allocation8] ss:$12 sps:$4 sm:$0xff]  }
  0x52   :  { %701 = vmatprep.subr.bf16.mxu1 %v949_v0  ;;  %v791_v26 = vld [vmem:[#allocation7 + $0x98] ss:$12 sps:$4 sm:$0xff]   ;;  %v790_v29 = vld [vmem:[#allocation8 + $0x1c] ss:$12 sps:$4 sm:$0xff]   ;;  %v794_v32 = vld [vmem:[#allocation8 + $0x34] ss:$12 sps:$4 sm:$0xff]  }
  0x53   :  { %v795_v30 = vld [vmem:[#allocation7 + $0xb0] ss:$12 sps:$4 sm:$0xff]   ;;  %v788_v31 = vld [vmem:[#allocation8 + $0x18] ss:$12 sps:$4 sm:$0xff]   ;;  %v799_v33 = vld [vmem:[#allocation8 + $0x8] ss:$12 sps:$4 sm:$0xff]  }
  0x54   :  { %294 = vmatpush1.bf16.msra.mxu0 %v763_v8  ;;  %v792_v34 = vld [vmem:[#allocation8 + $0x30] ss:$12 sps:$4 sm:$0xff]   ;;  %v798_v35 = vld [vmem:[#allocation8 + $0x4c] ss:$12 sps:$4 sm:$0xff]   ;;  %v796_v37 = vld [vmem:[#allocation8 + $0x48] ss:$12 sps:$4 sm:$0xff]  }
  0x55   :  { %295 = vmatprep.subr.bf16.mxu0 %v764_v9  ;;  %702 = vmatpush3.bf16.msra.mxu1 %v775_v13  ;;  %v803_v36 = vld [vmem:[#allocation8 + $0x20] ss:$12 sps:$4 sm:$0xff]   ;;  %v802_v38 = vld [vmem:[#allocation8 + $0x64] ss:$12 sps:$4 sm:$0xff]   ;;  %v806_v41 = vld [vmem:[#allocation8 + $0x7c] ss:$12 sps:$4 sm:$0xff]  }
  0x56   :  { %703 = vmatprep.subr.bf16.mxu1 %v949_v0  ;;  %v807_v39 = vld [vmem:[#allocation8 + $0x38] ss:$12 sps:$4 sm:$0xff]   ;;  %v800_v40 = vld [vmem:[#allocation8 + $0x60] ss:$12 sps:$4 sm:$0xff]   ;;  %v811_v42 = vld [vmem:[#allocation8 + $0x50] ss:$12 sps:$4 sm:$0xff]  }
  0x57   :  { %v804_v43 = vld [vmem:[#allocation8 + $0x78] ss:$12 sps:$4 sm:$0xff]   ;;  %v810_v44 = vld [vmem:[#allocation8 + $0x94] ss:$12 sps:$4 sm:$0xff]   ;;  %v808_v46 = vld [vmem:[#allocation8 + $0x90] ss:$12 sps:$4 sm:$0xff]  }
  0x58   :  { %296 = vmatpush1.bf16.msra.mxu0 %v766_v11  ;;  %v815_v45 = vld [vmem:[#allocation8 + $0x68] ss:$12 sps:$4 sm:$0xff]   ;;  %v814_v47 = vld [vmem:[#allocation8 + $0xac] ss:$12 sps:$4 sm:$0xff]   ;;  %v818_v53 = vld [vmem:[#allocation8 + $0xb0] ss:$12 sps:$4 sm:$0xff]  }
  0x59   :  { %297 = vmatprep.subr.bf16.mxu0 %v768_v12  ;;  %704 = vmatpush3.bf16.msra.mxu1 %v779_v16  ;;  %v816_v48 = vld [vmem:[#allocation8 + $0x80] ss:$12 sps:$4 sm:$0xff]   ;;  %v812_v49 = vld [vmem:[#allocation8 + $0xa8] ss:$12 sps:$4 sm:$0xff]   ;;  %v77_v50 = vld [vmem:[#allocation5] sm:$0xff]  ;;  %v147_v59 = vshrl.u32 %v146_v58, 7 }
  0x5a   :  { %705 = vmatprep.subr.bf16.mxu1 %v949_v0  ;;  %v817_v51 = vld [vmem:[#allocation8 + $0x98] ss:$12 sps:$4 sm:$0xff]   ;;  %v370_v52 = vpack.c.bf16 %v77_v50, %v77_v50  ;;  %v143_v61 = vld [vmem:[%s1081_s5] sm:$0x7] }
  0x5b   :  { %v148_v60 = vsub.s32 0, %v147_v59  ;;  %v142_v62 = vld [vmem:[%s1080_s4] sm:$0x7]  ;;  %v152_v63 = vsub.s32 1, %v147_v59  ;;  %s952_s4 = smov [#allocation10]  }
  0x5c   :  { %298 = vmatpush1.bf16.msra.mxu0 %v770_v14  ;;  %s620_s5 = sshll.u32 %s952_s4, 4  ;;  %s621_s5 = int_to_ptr.vmem [resolvable:$true] %s620_s5 }
  0x5d   :  { %299 = vmatprep.subr.bf16.mxu0 %v772_v15  ;;  %706 = vmatpush3.bf16.msra.mxu1 %v783_v19  ;;  %v153_v2 = vrot.slane %v142_v62, %v152_v63  ;;  %v379_v3 = vrot.slane %v143_v61, %v152_v63  ;;  %s913_s22 = scalar_lea.vmem %s621_s5, 128  ;;  %p918_p5 = scmp.lt.s32.totalorder %s621_s5, %s621_s5 }
  0x5e   :  { %707 = vmatprep.subr.bf16.mxu1 %v949_v0  ;;  %p914_p4 = scmp.ne.s32.totalorder %s621_s5, %s913_s22  ;;  %p919_p6 = scmp.lt.s32.totalorder %s913_s22, %s913_s22 }
  0x5f   :  { %v739_v6 = vadd.f32 %v379_v3, %v153_v2 }
  0x60   :  { %300 = vmatpush1.bf16.msra.mxu0 %v774_v17  ;;  %p920_p7 = por %p919_p6, %p918_p5 }
  0x61   :  { %301 = vmatprep.subr.bf16.mxu0 %v776_v18  ;;  %708 = vmatpush3.bf16.msra.mxu1 %v787_v22  ;;  %v156_v18 = vsub.s32 2, %v147_v59 }
  0x62   :  { %709 = vmatprep.subr.bf16.mxu1 %v949_v0  ;;  %p921_p8 = pnand %p920_p7, %p914_p4 }
  0x63   :  { %v383_v19 = vrot.slane %v143_v61, %v156_v18 }
  0x64   :  { %302 = vmatpush1.bf16.msra.mxu0 %v778_v20 }
  0x65   :  { %303 = vmatprep.subr.bf16.mxu0 %v780_v21  ;;  %710 = vmatpush3.bf16.msra.mxu1 %v791_v26  ;;  %v157_v21 = vrot.slane %v142_v62, %v156_v18 }
  0x66   :  { %711 = vmatprep.subr.bf16.mxu1 %v949_v0 }
  0x68   :  { %304 = vmatpush1.bf16.msra.mxu0 %v782_v23 }
  0x69   :  { %515 = vmatprep.subr.bf16.mxu0 %v786_v25  ;;  %712 = vmatpush3.bf16.msra.mxu1 %v795_v30 }
  0x6a   :  { %717 = vmatprep.subr.bf16.mxu1 %v949_v0 }
  0x6b   :  { %322 = vmatmul.mubr.bf16.vlgmr.msra.gmra.mrb[0].mxu0 %v144_v28 }
  0x6c   :  { %516 = vmatpush1.bf16.msra.mxu0 %v784_v27  ;;  %547 = vmatprep.mubr.bf16.mxu0 %v950_v1  ;;  %v375_v1 = vrot.slane %v143_v61, %v148_v60 }
  0x6d   :  { %517 = vmatprep.subr.bf16.mxu0 %v790_v29  ;;  %714 = vmatmul.mubr.bf16.vlgmr.msra.gmra.mrb[0].mxu1 %v144_v28 }
  0x6e   :  { %718 = vmatpush3.bf16.msra.mxu1 %v799_v33  ;;  %733 = vmatprep.mubr.msk.bf16.mxu1 %vm951_vm0, %v949_v0 }
  0x6f   :  { %719 = vmatprep.subr.bf16.mxu1 %v949_v0 }
  0x70   :  { %518 = vmatpush1.bf16.msra.mxu0 %v788_v31 }
  0x71   :  { %519 = vmatprep.subr.bf16.mxu0 %v794_v32 }
  0x72   :  { %720 = vmatpush3.bf16.msra.mxu1 %v803_v36 }
  0x73   :  { %721 = vmatprep.subr.bf16.mxu1 %v949_v0 }
  0x74   :  { %520 = vmatpush1.bf16.msra.mxu0 %v792_v34 }
  0x75   :  { %521 = vmatprep.subr.bf16.mxu0 %v798_v35 }
  0x76   :  { %722 = vmatpush3.bf16.msra.mxu1 %v807_v39 }
  0x77   :  { %723 = vmatprep.subr.bf16.mxu1 %v949_v0 }
  0x78   :  { %522 = vmatpush1.bf16.msra.mxu0 %v796_v37 }
  0x79   :  { %523 = vmatprep.subr.bf16.mxu0 %v802_v38 }
  0x7a   :  { %724 = vmatpush3.bf16.msra.mxu1 %v811_v42 }
  0x7b   :  { %725 = vmatprep.subr.bf16.mxu1 %v949_v0 }
  0x7c   :  { %524 = vmatpush1.bf16.msra.mxu0 %v800_v40 }
  0x7d   :  { %525 = vmatprep.subr.bf16.mxu0 %v806_v41 }
  0x7e   :  { %726 = vmatpush3.bf16.msra.mxu1 %v815_v45 }
  0x7f   :  { %727 = vmatprep.subr.bf16.mxu1 %v949_v0 }
  0x80   :  { %526 = vmatpush1.bf16.msra.mxu0 %v804_v43 }
  0x81   :  { %527 = vmatprep.subr.bf16.mxu0 %v810_v44 }
  0x82   :  { %728 = vmatpush3.bf16.msra.mxu1 %v816_v48 }
  0x83   :  { %729 = vmatprep.subr.bf16.mxu1 %v949_v0 }
  0x84   :  { %528 = vmatpush1.bf16.msra.mxu0 %v808_v46 }
  0x85   :  { %529 = vmatprep.subr.bf16.mxu0 %v814_v47 }
  0x86   :  { %730 = vmatpush3.bf16.msra.mxu1 %v817_v51 }
  0x87   :  { %731 = vmatprep.subr.bf16.mxu1 %v949_v0  ;;  %v149_v0 = vrot.slane %v142_v62, %v148_v60 }
  0x88   :  { %530 = vmatpush1.bf16.msra.mxu0 %v812_v49 }
  0x89   :  { %v737_v4 = vadd.f32 %v375_v1, %v149_v0 }
  0x8a   :  { %732 = vmatpush3.bf16.msra.mxu1 %v818_v53 }
  0x8b   :  { %548 = vmatmul.mubr.bf16.vlgmr.msra.gmra.mrb[0].mxu0 %v370_v52 }
  0x8d   :  { %734 = vmatmul.mubr.bf16.vlgmr.msra.gmra.mrb[4].mxu1 %v370_v52 }
 0x140   :  { %v364_v54 = vpop.f32.mrb[0].mxu1 }
 0x141   :  { %v715_v55 = vpop.f32.mrb[1].mxu1  ;;  %v365_v25 = vadd.f32 %v364_v54, %v157_v21 }
 0x142   :  { %v367_v56 = vpop.f32.mrb[2].mxu1 }
 0x143   :  { %v716_v57 = vpop.f32.mrb[3].mxu1 }
 0x15e   :  { %v549_v5 = vpop.f32.mrb[0].mxu0 }
 0x15f   :  { %v738_v7 = vadd.f32 %v737_v4, %v549_v5  ;;  %v551_v8 = vpop.f32.mrb[1].mxu0 }
 0x160   :  { %v553_v9 = vpop.f32.mrb[2].mxu0  ;;  %v740_v12 = vadd.f32 %v739_v6, %v551_v8  ;;  %v590_v13 = vpop.f32.mrb[4].mxu1 }
 0x161   :  { %v597_v10 = vmul.f32 0.5, %v738_v7  ;;  %v554_v11 = vpop.f32.mrb[3].mxu0  ;;  %v735_v14 = vpop.f32.mrb[5].mxu1  ;;  %v591_v23 = vadd.f32 %v590_v13, %v383_v19 }
 0x162   :  { %v593_v15 = vpop.f32.mrb[6].mxu1  ;;  %v602_v16 = vmul.f32 0.5, %v740_v12 }
 0x163   :  { %819 = vtanh.f32 %v597_v10  ;;  %v736_v17 = vpop.f32.mrb[7].mxu1 }
 0x164   :  { %821 = vtanh.f32 %v602_v16 }
 0x16d   :  { %v820_v20 = vpop.eup %819 }
 0x16e   :  { %v599_v22 = vadd.f32 1.0, %v820_v20  ;;  %v822_v27 = vpop.eup %821 }
 0x16f   :  { %v604_v29 = vadd.f32 1.0, %v822_v27 }
 0x170   :  { %v600_v24 = vmul.f32 0.5, %v599_v22 }
 0x171   :  { %v605_v30 = vmul.f32 0.5, %v604_v29 }
 0x172   :  { %v606_v26 = vmul.f32 %v600_v24, %v591_v23 }
 0x173   :  { %v609_v31 = vsub.f32 1.0, %v605_v30  ;;  %v611_v34 = vmul.f32 %v605_v30, %v77_v50 }
 0x174   :  { %v607_v28 = vadd.f32 %v606_v26, %v365_v25 }
 0x176   :  { %823 = vtanh.f32 %v607_v28 }
 0x180   :  { %v824_v32 = vpop.eup %823 }
 0x181   :  { %v610_v33 = vmul.f32 %v824_v32, %v609_v31 }
 0x183   :  { %v612_v35 = vadd.f32 %v611_v34, %v610_v33 }
 0x185   :  { %613 = vst [vmem:[#allocation10] sm:$0xff] %v612_v35 }
 0x186   :  { %924 = shalt.err (!%p921_p8)
}
 0x187   :  { %s925_s26 = scalar_lea.hbm %s1082_s6, 128 }
 0x188   :  { %p926_p9 = scmp.ne.s32.totalorder %s1082_s6, %s925_s26  ;;  %p929_p10 = scmp.lt.u32.totalorder %s925_s26, %s1082_s6 }
 0x18a   :  { %p931_p11 = pnand %p929_p10, %p926_p9 }
 0x18c   :  { %934 = shalt.err (!%p931_p11)
}
 0x18d   :  { %623 = dma.vmem_to_hbm [thread:$0]  %s621_s5, 128, %s1082_s6, [#allocation4]  }
 0x18e   :  { %941 = dma.done.wait [#allocation4], 128  }
 0x18f   :  { %942 = vsyncadd [#allocation4], 4294967168 }
 0x190   :  { %627 = vsyncpa [#allocation3], 1 }
 0x191   :  { %628 = vsyncpa [#allocation6], 1 }
 0x192   :  { %629 = vsyncpa [#allocation9], 1 }
 0x193   :  { %630 = vsyncpa [#allocation4], 1 }

</bundles_post_ra>
